<compile_context>
chip_gen: v7x
topology: tpu7x:2x2x1
jax: 0.10.0
libtpu: 0.0.40
codegen_flags: <defaults>
</compile_context>

<pallas_src>
import functools

import jax
import jax.numpy as jnp
from jax.experimental import pallas as pl
from jax.experimental.pallas import tpu as pltpu

LANE = 128


def _round_up(v, m):
    return (v + m - 1) // m * m


def _pick_spatial_tile(P, cap=1024):
    """Largest lane-friendly divisor of P (multiple of 128, else of 8), leaving
    >=2 steps on the pooled-reduction axis when possible so the patch DMA
    pipelines against the conv matmul."""
    for mult in (128, 8):
        best = 0
        d = mult
        while d <= min(P, cap):
            if P % d == 0:
                best = d
            d += mult
        if best:
            if best == P and P % 2 == 0 and (P // 2) % mult == 0:
                best = P // 2          # prefer 2 pipelined reduction steps over 1
            return best
    # TODO(synk): if P has no multiple-of-8 divisor, pad P in the wrapper and mask
    # the padded rows' contribution to the pooled sum in-kernel (relu(bias) != 0).
    return P


def _pick_batch_tile(B, TP, K, itemsize=2, target_bytes=4 << 20, cap=512):
    """Batch tile TB: divides B, sublane-friendly (multiple of 8 or == B), sized
    so the per-step patch block ~= target_bytes, and preferring >=2 batch steps
    (v7x 2-TC 'parallel' sharding) when a fitting tile allows it."""
    row_bytes = TP * K * itemsize
    tb_cap = int(max(1, min(cap, target_bytes // max(row_bytes, 1))))
    candidates = [d for d in range(1, B + 1)
                  if B % d == 0 and (d % 8 == 0 or d == B)]
    fitting = [d for d in candidates if d <= tb_cap]
    multi = [d for d in fitting if B // d >= 2]
    if multi:
        return max(multi)
    if fitting:
        return max(fitting)
    return min(candidates)


def drcnet_kernel(patch_ref, wconv_ref, bconv_ref, wheads_ref, bheads_ref,
                  feat_ref, heads_ref, acc_ref, *, inv_p):
    # patch_ref : (TB, TP, K)   bf16  im2col patches (K = C*9, UNPADDED in HBM)
    # wconv_ref : (K, Fp)       bf16  conv weight (only F lane-padded)
    # bconv_ref : (1, Fp)       f32
    # wheads_ref: (Fp, NHp)     bf16  [w_cls | w_aux] fused, lane-padded
    # bheads_ref: (1, NHp)      f32
    # feat_ref  : (TB, Fp)      f32   output (padded features)
    # heads_ref : (TB, NHp)     f32   output (padded fused logits)
    # acc_ref   : (TB, Fp)      f32   pooled-sum accumulator (VMEM scratch)
    p = pl.program_id(1)

    @pl.when(p == 0)
    def _():
        acc_ref[...] = jnp.zeros_like(acc_ref)

    tb, tp, k = patch_ref.shape
    # (TB, TP, K) -> (TB*TP, K): K stays minor, so the reshape only folds the
    # batch tile into sublanes; one 2-D matmul fills the MXU row dimension.
    x = patch_ref[...].reshape(tb * tp, k)
    # 36-deep contraction; Mosaic masks/pads the non-native K on the MXU
    # (acceptable per review — the kernel is DMA-bound, not MXU-bound).
    h = jnp.dot(x, wconv_ref[...], preferred_element_type=jnp.float32)
    h = jnp.maximum(h + bconv_ref[...], 0.0)             # bias + ReLU (f32, VPU)
    # Partial global-average-pool: accumulate the spatial sum per batch row.
    acc_ref[...] += h.reshape(tb, tp, -1).sum(axis=1)

    @pl.when(p == pl.num_programs(1) - 1)
    def _():
        feat = acc_ref[...] * inv_p                      # mean = sum * (1/P)
        feat_ref[...] = feat.astype(feat_ref.dtype)
        # Fused backbone-classifier + DRC aux head: one (Fp, NHp) MXU matmul.
        heads = jnp.dot(feat.astype(wheads_ref.dtype), wheads_ref[...],
                        preferred_element_type=jnp.float32) + bheads_ref[...]
        heads_ref[...] = heads.astype(heads_ref.dtype)


def drcnet_forward(x_nchw, params):
    """x_nchw: (B, C, H, W) float32.  Returns dict with feat, logits, logits_aux."""
    B, C, H, W = x_nchw.shape
    KH = KW = 3
    F = params["w_conv"].shape[0]       # num_features
    NC = params["w_cls"].shape[0]       # num_classes
    P = H * W
    K = C * KH * KW

    Fp = _round_up(F, LANE)
    NHp = _round_up(2 * NC, LANE)

    # --- glue: im2col with padding=1 (channel slowest, then kh, kw).
    # Cast to bf16 FIRST (halves the wrapper's HBM traffic for this chain) and
    # do NOT pad K — the kernel reads the lean (B, P, 36) stream directly. ---
    x_pad = jnp.pad(x_nchw.astype(jnp.bfloat16), ((0, 0), (0, 0), (1, 1), (1, 1)))
    cols = [x_pad[:, :, i:i + H, j:j + W] for i in range(KH) for j in range(KW)]
    patches = jnp.stack(cols, axis=2)                   # (B, C, 9, H, W) bf16
    patches = patches.reshape(B, K, H, W)               # C slowest -> torch layout
    patches = patches.transpose(0, 2, 3, 1).reshape(B, P, K)

    # --- weights: conv as (K, Fp) matmul, heads fused to (Fp, NHp); only the
    # output-feature (lane) dims are zero-padded — loaded once per kernel. ---
    w_conv = params["w_conv"].reshape(F, K).T           # (K, F)
    w_conv_p = jnp.zeros((K, Fp), jnp.bfloat16).at[:, :F].set(
        w_conv.astype(jnp.bfloat16))
    b_conv_p = jnp.zeros((1, Fp), jnp.float32).at[0, :F].set(params["b_conv"])

    w_heads = jnp.concatenate([params["w_cls"].T, params["w_aux"].T], axis=1)
    w_heads_p = jnp.zeros((Fp, NHp), jnp.bfloat16).at[:F, :2 * NC].set(
        w_heads.astype(jnp.bfloat16))
    b_heads = jnp.concatenate([params["b_cls"], params["b_aux"]])
    b_heads_p = jnp.zeros((1, NHp), jnp.float32).at[0, :2 * NC].set(b_heads)

    # --- tiling: bounded batch tile ('parallel'), spatial reduction axis last ---
    TP = _pick_spatial_tile(P)
    TB = _pick_batch_tile(B, TP, K)
    grid = (B // TB, P // TP)

    # Scoped-VMEM budget: double-buffered patch block dominates; 48 MiB cap keeps
    # the same number legal on v7x (64 MiB physical per TC).
    patch_blk = TB * TP * K * 2
    w_bytes = (K * Fp + Fp * NHp) * 2 + (Fp + NHp) * 4
    out_blk = TB * (Fp + NHp) * 4
    acc_blk = TB * Fp * 4
    need = 2 * patch_blk + 2 * w_bytes + 2 * out_blk + acc_blk
    vmem_limit = int(min(max(2 * need, 32 << 20), 48 << 20))

    cost = pl.CostEstimate(
        flops=2 * B * P * K * F + 2 * B * F * (2 * NC),
        transcendentals=0,
        bytes_accessed=B * P * K * 2 + w_bytes + B * (Fp + NHp) * 4)

    kernel = functools.partial(drcnet_kernel, inv_p=1.0 / P)

    feat_p, heads_p = pl.pallas_call(
        kernel,
        grid=grid,
        in_specs=[
            # last dim K=36 equals the full array dim -> satisfies (8,128) rule
            pl.BlockSpec((TB, TP, K), lambda b, p: (b, p, 0)),
            pl.BlockSpec((K, Fp), lambda b, p: (0, 0)),
            pl.BlockSpec((1, Fp), lambda b, p: (0, 0)),
            pl.BlockSpec((Fp, NHp), lambda b, p: (0, 0)),
            pl.BlockSpec((1, NHp), lambda b, p: (0, 0)),
        ],
        out_specs=[
            pl.BlockSpec((TB, Fp), lambda b, p: (b, 0)),
            pl.BlockSpec((TB, NHp), lambda b, p: (b, 0)),
        ],
        out_shape=[
            jax.ShapeDtypeStruct((B, Fp), jnp.float32),
            jax.ShapeDtypeStruct((B, NHp), jnp.float32),
        ],
        scratch_shapes=[pltpu.VMEM((TB, Fp), jnp.float32)],
        compiler_params=pltpu.CompilerParams(
            dimension_semantics=("parallel", "arbitrary"),
            vmem_limit_bytes=vmem_limit),
        cost_estimate=cost,
    )(patches, w_conv_p, b_conv_p, w_heads_p, b_heads_p)

    # Slice padded outputs back to logical shapes.
    feat = feat_p[:, :F]
    logits = heads_p[:, :NC]
    logits_aux = heads_p[:, NC:2 * NC]
    return {"feat": feat, "logits": logits, "logits_aux": logits_aux}


def reference_forward(x_nchw, params):
    """Pure-JAX f32 reference of the same synthetic backbone + DRC heads."""
    B, C, H, W = x_nchw.shape
    F = params["w_conv"].shape[0]
    K = C * 9
    x_pad = jnp.pad(x_nchw, ((0, 0), (0, 0), (1, 1), (1, 1)))
    cols = [x_pad[:, :, i:i + H, j:j + W] for i in range(3) for j in range(3)]
    patches = jnp.stack(cols, axis=2).reshape(B, K, H, W)
    patches = patches.transpose(0, 2, 3, 1).reshape(B, H * W, K)
    h = jnp.maximum(
        jnp.einsum("bpk,kf->bpf", patches, params["w_conv"].reshape(F, K).T)
        + params["b_conv"], 0.0)
    feat = jnp.mean(h, axis=1)
    logits = feat @ params["w_cls"].T + params["b_cls"]
    logits_aux = feat @ params["w_aux"].T + params["b_aux"]
    return {"feat": feat, "logits": logits, "logits_aux": logits_aux}


def init_params(key, c_in=4, num_features=32, num_classes=10):
    ks = jax.random.split(key, 6)
    scale = 0.05
    return {
        # synthetic backbone conv (PyTorch Conv2d weight layout: O, I, kh, kw)
        "w_conv": scale * jax.random.normal(ks[0], (num_features, c_in, 3, 3), jnp.float32),
        "b_conv": scale * jax.random.normal(ks[1], (num_features,), jnp.float32),
        # backbone classifier (PyTorch Linear layout: out, in)
        "w_cls": scale * jax.random.normal(ks[2], (num_classes, num_features), jnp.float32),
        "b_cls": scale * jax.random.normal(ks[3], (num_classes,), jnp.float32),
        # DRCNet aux_classifier = nn.Linear(num_features, num_classes)
        "w_aux": scale * jax.random.normal(ks[4], (num_classes, num_features), jnp.float32),
        "b_aux": scale * jax.random.normal(ks[5], (num_classes,), jnp.float32),
    }


if __name__ == "__main__":
    key = jax.random.PRNGKey(0)
    k_x, k_p = jax.random.split(key)

    B, C, H, W = 2, 4, 16, 16
    num_features, num_classes = 32, 10

    x = jax.random.normal(k_x, (B, C, H, W), jnp.float32)   # NCHW, like PyTorch
    params = init_params(k_p, c_in=C, num_features=num_features,
                         num_classes=num_classes)

    out = drcnet_forward(x, params)
    jax.block_until_ready(out)

    assert out["feat"].shape == (B, num_features)
    assert out["logits"].shape == (B, num_classes)
    assert out["logits_aux"].shape == (B, num_classes)

    # Full f32 reference (tolerance loosened for bf16 MXU inputs, f32 accumulation).
    ref = reference_forward(x, params)
    assert jnp.allclose(out["feat"], ref["feat"], atol=2e-2)
    assert jnp.allclose(out["logits"], ref["logits"], atol=2e-2)
    assert jnp.allclose(out["logits_aux"], ref["logits_aux"], atol=2e-2)

    # DRC aux-head semantics check against the kernel's own feat.
    ref_aux = out["feat"] @ params["w_aux"].T + params["b_aux"]
    assert jnp.allclose(out["logits_aux"], ref_aux, atol=5e-3)

    print("KERNEL_OK")
</pallas_src>

<mosaic_0001>
module attributes {stable_mosaic.version = 11 : i64} {
  func.func @drcnet_kernel(%arg0: i32, %arg1: i32, %arg2: memref<2x128x36xbf16, #tpu.memory_space<vmem>>, %arg3: memref<36x128xbf16, #tpu.memory_space<vmem>>, %arg4: memref<1x128xf32, #tpu.memory_space<vmem>>, %arg5: memref<128x128xbf16, #tpu.memory_space<vmem>>, %arg6: memref<1x128xf32, #tpu.memory_space<vmem>>, %arg7: memref<2x128xf32, #tpu.memory_space<vmem>>, %arg8: memref<2x128xf32, #tpu.memory_space<vmem>>, %arg9: memref<2x128xf32, #tpu.memory_space<vmem>>) attributes {dimension_semantics = [#tpu.dimension_semantics<parallel>, #tpu.dimension_semantics<arbitrary>], iteration_bounds = array<i64: 1, 2>, scalar_prefetch = 0 : i64, scratch_operands = 1 : i64, tpu.core_type = #tpu.core_type<tc>, window_params = [{transform_indices = @transform_0, window_bounds = array<i64: 2, 128, 36>}, {pipeline_mode = #tpu.pipeline_mode<synchronous>, transform_indices = @transform_1, window_bounds = array<i64: 36, 128>}, {pipeline_mode = #tpu.pipeline_mode<synchronous>, transform_indices = @transform_2, window_bounds = array<i64: 1, 128>}, {pipeline_mode = #tpu.pipeline_mode<synchronous>, transform_indices = @transform_3, window_bounds = array<i64: 128, 128>}, {pipeline_mode = #tpu.pipeline_mode<synchronous>, transform_indices = @transform_4, window_bounds = array<i64: 1, 128>}, {transform_indices = @transform_5, window_bounds = array<i64: 2, 128>}, {transform_indices = @transform_6, window_bounds = array<i64: 2, 128>}]} {
    %c0_i32 = arith.constant 0 : i32
    %0 = arith.cmpi eq, %arg1, %c0_i32 : i32
    %1 = arith.extui %0 : i1 to i32
    %c0_i32_0 = arith.constant 0 : i32
    %2 = arith.cmpi ne, %1, %c0_i32_0 : i32
    scf.if %2 {
      %cst_14 = arith.constant 0.000000e+00 : f32
      %20 = vector.broadcast %cst_14 : f32 to vector<2x128xf32>
      %c0_15 = arith.constant 0 : index
      %c0_16 = arith.constant 0 : index
      %21 = vector.load %arg9[%c0_15, %c0_16] : memref<2x128xf32, #tpu.memory_space<vmem>>, vector<2x128xf32>
      tpu.vector_store %arg9[%c0_15, %c0_16], %20 {strides = array<i32>} : memref<2x128xf32, #tpu.memory_space<vmem>>, vector<2x128xf32>,
    } else {
    }
    %c0 = arith.constant 0 : index
    %c0_1 = arith.constant 0 : index
    %c0_2 = arith.constant 0 : index
    %3 = vector.load %arg2[%c0, %c0_1, %c0_2] : memref<2x128x36xbf16, #tpu.memory_space<vmem>>, vector<2x128x36xbf16>
    %4 = vector.shape_cast %3 : vector<2x128x36xbf16> to vector<256x36xbf16>
    %c0_3 = arith.constant 0 : index
    %c0_4 = arith.constant 0 : index
    %5 = vector.load %arg3[%c0_3, %c0_4] : memref<36x128xbf16, #tpu.memory_space<vmem>>, vector<36x128xbf16>
    %cst = arith.constant dense<0.000000e+00> : vector<256x128xf32>
    %6 = tpu.matmul %4, %5, %cst {dimension_numbers = #tpu.dot_dimension_numbers<[1], [0], [0], [1], [0, 0, 1, 1], [], []>} : vector<256x36xbf16>, vector<36x128xbf16>, vector<256x128xf32> -> vector<256x128xf32>
    %c0_5 = arith.constant 0 : index
    %c0_6 = arith.constant 0 : index
    %7 = vector.load %arg4[%c0_5, %c0_6] : memref<1x128xf32, #tpu.memory_space<vmem>>, vector<1x128xf32>
    %8 = vector.broadcast %7 : vector<1x128xf32> to vector<256x128xf32>
    %9 = arith.addf %6, %8 : vector<256x128xf32>
    %cst_7 = arith.constant 0.000000e+00 : f32
    %10 = vector.broadcast %cst_7 : f32 to vector<256x128xf32>
    %11 = arith.maximumf %9, %10 : vector<256x128xf32>
    %c0_8 = arith.constant 0 : index
    %c0_9 = arith.constant 0 : index
    %12 = vector.load %arg9[%c0_8, %c0_9] : memref<2x128xf32, #tpu.memory_space<vmem>>, vector<2x128xf32>
    %13 = vector.shape_cast %11 : vector<256x128xf32> to vector<2x128x128xf32>
    %cst_10 = arith.constant dense<0.000000e+00> : vector<2x128xf32>
    %14 = vector.multi_reduction <add>, %13, %cst_10 [1] : vector<2x128x128xf32> to vector<2x128xf32>
    %15 = arith.addf %12, %14 : vector<2x128xf32>
    %c0_11 = arith.constant 0 : index
    %c0_12 = arith.constant 0 : index
    %16 = vector.load %arg9[%c0_11, %c0_12] : memref<2x128xf32, #tpu.memory_space<vmem>>, vector<2x128xf32>
    tpu.vector_store %arg9[%c0_11, %c0_12], %15 {strides = array<i32>} : memref<2x128xf32, #tpu.memory_space<vmem>>, vector<2x128xf32>,
    %c1_i32 = arith.constant 1 : i32
    %17 = arith.cmpi eq, %arg1, %c1_i32 : i32
    %18 = arith.extui %17 : i1 to i32
    %c0_i32_13 = arith.constant 0 : i32
    %19 = arith.cmpi ne, %18, %c0_i32_13 : i32
    scf.if %19 {
      %c0_14 = arith.constant 0 : index
      %c0_15 = arith.constant 0 : index
      %20 = vector.load %arg9[%c0_14, %c0_15] : memref<2x128xf32, #tpu.memory_space<vmem>>, vector<2x128xf32>
      %cst_16 = arith.constant 3.906250e-03 : f32
      %21 = vector.broadcast %cst_16 : f32 to vector<2x128xf32>
      %22 = arith.mulf %20, %21 : vector<2x128xf32>
      %c0_17 = arith.constant 0 : index
      %c0_18 = arith.constant 0 : index
      %23 = vector.load %arg7[%c0_17, %c0_18] : memref<2x128xf32, #tpu.memory_space<vmem>>, vector<2x128xf32>
      tpu.vector_store %arg7[%c0_17, %c0_18], %22 {strides = array<i32>} : memref<2x128xf32, #tpu.memory_space<vmem>>, vector<2x128xf32>,
      %24 = arith.truncf %22 : vector<2x128xf32> to vector<2x128xbf16>
      %c0_19 = arith.constant 0 : index
      %c0_20 = arith.constant 0 : index
      %25 = vector.load %arg5[%c0_19, %c0_20] : memref<128x128xbf16, #tpu.memory_space<vmem>>, vector<128x128xbf16>
      %cst_21 = arith.constant dense<0.000000e+00> : vector<2x128xf32>
      %26 = tpu.matmul %24, %25, %cst_21 {dimension_numbers = #tpu.dot_dimension_numbers<[1], [0], [0], [1], [0, 0, 1, 1], [], []>} : vector<2x128xbf16>, vector<128x128xbf16>, vector<2x128xf32> -> vector<2x128xf32>
      %c0_22 = arith.constant 0 : index
      %c0_23 = arith.constant 0 : index
      %27 = vector.load %arg6[%c0_22, %c0_23] : memref<1x128xf32, #tpu.memory_space<vmem>>, vector<1x128xf32>
      %28 = vector.broadcast %27 : vector<1x128xf32> to vector<2x128xf32>
      %29 = arith.addf %26, %28 : vector<2x128xf32>
      %c0_24 = arith.constant 0 : index
      %c0_25 = arith.constant 0 : index
      %30 = vector.load %arg8[%c0_24, %c0_25] : memref<2x128xf32, #tpu.memory_space<vmem>>, vector<2x128xf32>
      tpu.vector_store %arg8[%c0_24, %c0_25], %29 {strides = array<i32>} : memref<2x128xf32, #tpu.memory_space<vmem>>, vector<2x128xf32>,
    } else {
    }
    return
  }
  func.func @transform_0(%arg0: i32, %arg1: i32) -> (i32, i32, i32) {
    %c0_i32 = arith.constant 0 : i32
    %c0_i32_0 = arith.constant 0 : i32
    return %arg0, %arg1, %c0_i32 : i32, i32, i32
  }
  func.func @transform_1(%arg0: i32, %arg1: i32) -> (i32, i32) {
    %c0_i32 = arith.constant 0 : i32
    %c0_i32_0 = arith.constant 0 : i32
    %c0_i32_1 = arith.constant 0 : i32
    return %c0_i32, %c0_i32_0 : i32, i32
  }
  func.func @transform_2(%arg0: i32, %arg1: i32) -> (i32, i32) {
    %c0_i32 = arith.constant 0 : i32
    %c0_i32_0 = arith.constant 0 : i32
    %c0_i32_1 = arith.constant 0 : i32
    return %c0_i32, %c0_i32_0 : i32, i32
  }
  func.func @transform_3(%arg0: i32, %arg1: i32) -> (i32, i32) {
    %c0_i32 = arith.constant 0 : i32
    %c0_i32_0 = arith.constant 0 : i32
    %c0_i32_1 = arith.constant 0 : i32
    return %c0_i32, %c0_i32_0 : i32, i32
  }
  func.func @transform_4(%arg0: i32, %arg1: i32) -> (i32, i32) {
    %c0_i32 = arith.constant 0 : i32
    %c0_i32_0 = arith.constant 0 : i32
    %c0_i32_1 = arith.constant 0 : i32
    return %c0_i32, %c0_i32_0 : i32, i32
  }
  func.func @transform_5(%arg0: i32, %arg1: i32) -> (i32, i32) {
    %c0_i32 = arith.constant 0 : i32
    %c0_i32_0 = arith.constant 0 : i32
    return %arg0, %c0_i32 : i32, i32
  }
  func.func @transform_6(%arg0: i32, %arg1: i32) -> (i32, i32) {
    %c0_i32 = arith.constant 0 : i32
    %c0_i32_0 = arith.constant 0 : i32
    return %arg0, %c0_i32 : i32, i32
  }
}

</mosaic_0001>

<bundles_post_ra>
// kernel: tpu_custom_call.1
= control target key start
LH: loop header
LB: loop body
LE: loop exit
PB: predicated region body
PF: predicated region fallthrough
CT: control target
= control target key end

     0   :  { %12 = vsyncpa [#allocation5], 0  ;;  %s1713_s0 = inlined_call_operand.vmem [shape: bf16[2,256,36], index: 0, kind: input, shape index: {}]   ;;  %s1714_s1 = inlined_call_operand.vmem [shape: bf16[36,128], index: 1, kind: input, shape index: {}]   ;;  %s1715_s2 = inlined_call_operand.vmem [shape: f32[1,128], index: 2, kind: input, shape index: {}]   ;;  %s1716_s3 = inlined_call_operand.vmem [shape: bf16[128,128], index: 3, kind: input, shape index: {}]   ;;  %s1717_s4 = inlined_call_operand.vmem [shape: f32[1,128], index: 4, kind: input, shape index: {}]   ;;  %s1718_s5 = inlined_call_operand.hbm [shape: f32[2,128], index: 5, kind: output, shape index: {0}]   ;;  %s1719_s6 = inlined_call_operand.hbm [shape: f32[2,128], index: 6, kind: output, shape index: {1}]  }
   0x1   :  { %13 = vsyncpa [#allocation7], 0  ;;  %s1467_s21 = smov 0   ;;  %s1469_s22 = smov 0  }
   0x2   :  { %s1471_s23 = smov 0   ;;  %s1473_s24 = smov 0  }
   0x3   :  { %s1475_s25 = smov 0  }
   0x4 LB: > { %s1087_s26 = sadd.s32 4294967295, %s1425_s25   ;;  %s28_s27 = sadd.s32 1, %s1421_s24  ;;  %s1425_s25 = sphi %s1475_s25, %s19_s25   ;;  %s1421_s24 = sphi %s1473_s24, %s1724_s24   ;;  %s1417_s23 = sphi %s1471_s23, %s1723_s23   ;;  %s1413_s22 = sphi %s1469_s22, %s1722_s22   ;;  %s1409_s21 = sphi %s1467_s21, %s1721_s21  }
   0x5   : > { %p29_p0 = scmp.ge.s32.totalorder %s28_s27, 2  ;;  %p47_p1 = scmp.ne.s32.totalorder %s1413_s22, %s1409_s21 }
   0x6   : > { %p48_p2 = scmp.eq.s32.totalorder %s1425_s25, 0  ;;  %s40_s29 = sadd.s32 1, %s1413_s22 }
   0x7   : > { %s1726_s27 = smov (%p29_p0, %s28_s27), 0  ;;  %p1089_p5 = scmp.ge.s32.totalorder %s1425_s25, 2 }
   0x8   : > { %p49_p3 = por %p48_p2, %p47_p1  ;;  %s36_s28 = ssub.s32 %s1421_s24, %s1726_s27 }
   0x9   : > { %p38_p4 = scmp.eq.s32.totalorder %s36_s28, 0  ;;  %221 = sbr.rel (%p1089_p5) target bundleno = 28 (0x1c), region = 32 }
   0xb   : > { %s1503_s30 = scalar_select %p38_p4, %s1413_s22, %s40_s29  }
  0x10   : > { %224 = sbr.rel (!%p49_p3) target bundleno = 28 (0x1c), region = 36  ;;  %s226_s7 = sand.u32 (%p49_p3), 1, %s1413_s22  }
  0x11   : > { %s1148_s8 = sshll.u32 (%p49_p3), %s1421_s24, 6  ;;  %s1090_s9 = sshll.u32 (%p49_p3), %s226_s7, 7 }
  0x12   : > { %s1511_s12 = scalar_lea.vmem (%p49_p3), %s1713_s0, %s1148_s8  ;;  %s228_s13 = scalar_lea.vmem (%p49_p3), [#allocation3], %s1090_s9 }
  0x13   : > { %v250_v0 = vld [vmem:[%s1511_s12] sm:$0xff] (%p49_p3)   ;;  %v254_v1 = vld [vmem:[%s1511_s12 + $0x8] sm:$0xff] (%p49_p3)   ;;  %v258_v2 = vld [vmem:[%s1511_s12 + $0x10] sm:$0xff] (%p49_p3)  }
  0x14   : > { %251 = vst [vmem:[%s228_s13] sm:$0xff] (%p49_p3), %v250_v0   ;;  %255 = vst [vmem:[%s228_s13 + $0x8] sm:$0xff] (%p49_p3), %v254_v1   ;;  %v262_v3 = vld [vmem:[%s1511_s12 + $0x18] sm:$0xff] (%p49_p3)   ;;  %v266_v4 = vld [vmem:[%s1511_s12 + $0x20] sm:$0xff] (%p49_p3)  }
  0x15   : > { %259 = vst [vmem:[%s228_s13 + $0x10] sm:$0xff] (%p49_p3), %v258_v2   ;;  %v270_v5 = vld [vmem:[%s1511_s12 + $0x28] sm:$0xff] (%p49_p3)   ;;  %263 = vst [vmem:[%s228_s13 + $0x18] sm:$0xff] (%p49_p3), %v262_v3   ;;  %v274_v6 = vld [vmem:[%s1511_s12 + $0x30] sm:$0xff] (%p49_p3)  }
  0x16   : > { %267 = vst [vmem:[%s228_s13 + $0x20] sm:$0xff] (%p49_p3), %v266_v4   ;;  %271 = vst [vmem:[%s228_s13 + $0x28] sm:$0xff] (%p49_p3), %v270_v5   ;;  %v278_v7 = vld [vmem:[%s1511_s12 + $0x38] sm:$0xff] (%p49_p3)   ;;  %v282_v8 = vld [vmem:[%s1511_s12 + $0x80] sm:$0xff] (%p49_p3)  }
  0x17   : > { %275 = vst [vmem:[%s228_s13 + $0x30] sm:$0xff] %v274_v6   ;;  %279 = vst [vmem:[%s228_s13 + $0x38] sm:$0xff] %v278_v7   ;;  %v286_v9 = vld [vmem:[%s1511_s12 + $0x88] sm:$0xff]   ;;  %v290_v10 = vld [vmem:[%s1511_s12 + $0x90] sm:$0xff]  }
  0x18   : > { %283 = vst [vmem:[%s228_s13 + $0x40] sm:$0xff] %v282_v8   ;;  %v294_v11 = vld [vmem:[%s1511_s12 + $0x98] sm:$0xff]   ;;  %287 = vst [vmem:[%s228_s13 + $0x48] sm:$0xff] %v286_v9   ;;  %v298_v12 = vld [vmem:[%s1511_s12 + $0xa0] sm:$0xff]  }
  0x19   : > { %291 = vst [vmem:[%s228_s13 + $0x50] sm:$0xff] %v290_v10   ;;  %295 = vst [vmem:[%s228_s13 + $0x58] sm:$0xff] %v294_v11   ;;  %v302_v13 = vld [vmem:[%s1511_s12 + $0xa8] sm:$0xff]   ;;  %v306_v14 = vld [vmem:[%s1511_s12 + $0xb0] sm:$0xff]  }
  0x1a   : > { %299 = vst [vmem:[%s228_s13 + $0x60] sm:$0xff] %v298_v12   ;;  %303 = vst [vmem:[%s228_s13 + $0x68] sm:$0xff] %v302_v13   ;;  %v310_v15 = vld [vmem:[%s1511_s12 + $0xb8] sm:$0xff]  }
  0x1b   : > { %307 = vst [vmem:[%s228_s13 + $0x70] sm:$0xff] %v306_v14   ;;  %311 = vst [vmem:[%s228_s13 + $0x78] sm:$0xff] %v310_v15  }
  0x1c PF: > { %p1093_p6 = scmp.ge.s32.totalorder %s1425_s25, 1  ;;  %p399_p7 = scmp.lt.s32.totalorder %s1425_s25, 3 }
  0x1e   : > { %p400_p8 = pnand %p1093_p6, %p399_p7 }
  0x1f   : > { %s406_s14 = sand.u32 (!%p400_p8), 1, %s1409_s21   ;;  %p1095_p9 = scmp.ne.s32.totalorder (!%p400_p8), %s1417_s23, 0 }
  0x20   : > { %403 = sbr.rel (%p400_p8) target bundleno = 599 (0x257), region = 77  ;;  %s1094_s15 = sshll.u32 (!%p400_p8), %s406_s14, 7 }
  0x21   : > { %s1532_s16 = scalar_lea.vmem (!%p400_p8), [#allocation3], %s1094_s15 }
  0x27   : > { %436 = sbr.rel (%p1095_p9) target bundleno = 46 (0x2e), region = 85  ;;  %v1427_v16 = vmov (!%p1095_p9), 0.0  }
  0x28   : > { %437 = vst [vmem:[#allocation2] sm:$0x3] (!%p1095_p9), %v1427_v16 }
  0x2e PF: > { %v1300_v17 = vld [vmem:[%s1714_s1] sm:$0xff]   ;;  %v1301_v18 = vld [vmem:[%s1714_s1 + $0x8] sm:$0xff]   ;;  %vm577_vm0 = vcmask 293888   ;;  %v1302_v19 = vld [vmem:[%s1714_s1 + $0x10] ss:$0 sps:$4 sm:$0x33]  }
  0x2f   : > { %1177 = vmatprep.subr.bf16.mxu0 %v1300_v17  ;;  %1235 = vmatprep.subr.bf16.mxu1 %v1300_v17  ;;  %v1303_v20 = vld [vmem:[%s1532_s16] sm:$0xff]   ;;  %vm626_vm1 = vcmask 1041408   ;;  %v1305_v23 = vld [vmem:[%s1532_s16 + $0x8] sm:$0xff]   ;;  %v1307_v25 = vld [vmem:[%s1532_s16 + $0x10] sm:$0xff]   ;;  %vm868_vm2 = vcmask 1041409   ;;  %p1132_p10 = scmp.ne.s32.totalorder %s1417_s23, 1 }
  0x30   : > { %1178 = vmatpush3.bf16.msra.mxu0 %v1300_v17  ;;  %1238 = vmatpush3.bf16.msra.mxu1 %v1300_v17  ;;  %v1304_v21 = vld [vmem:[%s1532_s16 + $0x40] sm:$0xff]   ;;  %v628_v22 = vsel %vm626_vm1, %v1302_v19, 0  ;;  %v1306_v24 = vld [vmem:[%s1532_s16 + $0x48] sm:$0xff]   ;;  %v1308_v26 = vld [vmem:[%s1532_s16 + $0x50] sm:$0xff]   ;;  %vm1429_vm3 = vmmov (!%p1132_p10), 0  }
  0x31   : > { %1179 = vmatprep.subr.bf16.mxu0 %v1301_v18  ;;  %1236 = vmatprep.subr.bf16.mxu1 %v1301_v18  ;;  %v1309_v27 = vld [vmem:[%s1532_s16 + $0x18] sm:$0xff]   ;;  %v1311_v29 = vld [vmem:[%s1532_s16 + $0x20] sm:$0xff]   ;;  %v1313_v31 = vld [vmem:[%s1532_s16 + $0x28] sm:$0xff]  }
  0x32   : > { %1183 = vmatprep.mubr.msk.bf16.mxu0 %vm577_vm0, %v1303_v20  ;;  %1199 = vmatprep.mubr.msk.bf16.mxu1 %vm577_vm0, %v1304_v21  ;;  %v1310_v28 = vld [vmem:[%s1532_s16 + $0x58] sm:$0xff]   ;;  %v1312_v30 = vld [vmem:[%s1532_s16 + $0x60] sm:$0xff]   ;;  %v1314_v32 = vld [vmem:[%s1532_s16 + $0x68] sm:$0xff]  }
  0x33   : > { %v1315_v33 = vld [vmem:[%s1532_s16 + $0x30] sm:$0xff]   ;;  %v1317_v35 = vld [vmem:[%s1532_s16 + $0x38] sm:$0xff]  }
  0x34   : > { %1180 = vmatpush3.bf16.msra.mxu0 %v1301_v18  ;;  %1239 = vmatpush3.bf16.msra.mxu1 %v1301_v18  ;;  %v1316_v34 = vld [vmem:[%s1532_s16 + $0x70] sm:$0xff]   ;;  %v1318_v36 = vld [vmem:[%s1532_s16 + $0x78] sm:$0xff]  }
  0x35   : > { %1241 = vmatprep.subr.msk.bf16.mxu0 %vm626_vm1, %v1302_v19  ;;  %1242 = vmatprep.subr.msk.bf16.mxu1 %vm626_vm1, %v1302_v19  ;;  %v1579_v37 = vld [vmem:[%s1715_s2] ss:$0 sm:$0xff] }
  0x38   : > { %1182 = vmatpush3.bf16.msra.mxu0 %v628_v22  ;;  %1240 = vmatpush3.bf16.msra.mxu1 %v628_v22 }
  0x3b   : > { %1184 = vmatmul.mubr.msk.bf16.vlgmr.msra.gmra.mrb[0].mxu0 %vm577_vm0, %v1305_v23  ;;  %1200 = vmatmul.mubr.msk.bf16.vlgmr.msra.gmra.mrb[0].mxu1 %vm577_vm0, %v1306_v24 }
  0x3c   : > { %1187 = vmatprep.mubr.msk.bf16.mxu0 %vm577_vm0, %v1307_v25  ;;  %1203 = vmatprep.mubr.msk.bf16.mxu1 %vm577_vm0, %v1308_v26 }
  0x43   : > { %1188 = vmatmul.mubr.msk.bf16.gmra.mrb[4].mxu0 %vm577_vm0, %v1309_v27  ;;  %1204 = vmatmul.mubr.msk.bf16.gmra.mrb[4].mxu1 %vm577_vm0, %v1310_v28 }
  0x44   : > { %1191 = vmatprep.mubr.msk.bf16.mxu0 %vm577_vm0, %v1311_v29  ;;  %1207 = vmatprep.mubr.msk.bf16.mxu1 %vm577_vm0, %v1312_v30 }
  0x4b   : > { %1192 = vmatmul.mubr.msk.bf16.gmra.mrb[8].mxu0 %vm577_vm0, %v1313_v31  ;;  %1208 = vmatmul.mubr.msk.bf16.gmra.mrb[8].mxu1 %vm577_vm0, %v1314_v32 }
  0x4c   : > { %1195 = vmatprep.mubr.msk.bf16.mxu0 %vm577_vm0, %v1315_v33  ;;  %1211 = vmatprep.mubr.msk.bf16.mxu1 %vm577_vm0, %v1316_v34 }
  0x53   : > { %1196 = vmatmul.mubr.msk.bf16.gmra.mrb[12].mxu0 %vm577_vm0, %v1317_v35  ;;  %1212 = vmatmul.mubr.msk.bf16.gmra.mrb[12].mxu1 %vm577_vm0, %v1318_v36 }
 0x10e   : > { %v1185_v38 = vpop.f32.mrb[0].mxu0  ;;  %v1201_v39 = vpop.f32.mrb[0].mxu1 }
 0x10f   : > { %v664_v40 = vpop.f32.mrb[1].mxu0  ;;  %v728_v41 = vpop.f32.mrb[1].mxu1  ;;  %v673_v48 = vadd.f32 %v1185_v38, %v1579_v37  ;;  %v737_v49 = vadd.f32 %v1201_v39, %v1579_v37 }
 0x110   : > { %v665_v42 = vadd.f32 %v1579_v37, %v664_v40  ;;  %v729_v43 = vadd.f32 %v1579_v37, %v728_v41  ;;  %v1186_v44 = vpop.f32.mrb[2].mxu0  ;;  %v1202_v45 = vpop.f32.mrb[2].mxu1 }
 0x111   : > { %v667_v46 = vpop.f32.mrb[3].mxu0  ;;  %v731_v47 = vpop.f32.mrb[3].mxu1  ;;  %v676_v52 = vadd.f32 %v1186_v44, %v1579_v37  ;;  %v740_v53 = vadd.f32 %v1202_v45, %v1579_v37  ;;  %v793_v58 = vmax.f32 %v673_v48, 0.0  ;;  %v809_v59 = vmax.f32 %v737_v49, 0.0 }
 0x112   : > { %v668_v50 = vadd.f32 %v1579_v37, %v667_v46  ;;  %v732_v51 = vadd.f32 %v1579_v37, %v731_v47  ;;  %v791_v54 = vmax.f32 %v665_v42, 0.0  ;;  %v807_v55 = vmax.f32 %v729_v43, 0.0 }
 0x113   : > { %v794_v0 = vmax.f32 %v676_v52, 0.0  ;;  %v810_v1 = vmax.f32 %v740_v53, 0.0 }
 0x114   : > { %v792_v56 = vmax.f32 %v668_v50, 0.0  ;;  %v808_v57 = vmax.f32 %v732_v51, 0.0 }
 0x116   : > { %v824_v60 = vadd.f32 %v792_v56, %v791_v54  ;;  %v845_v61 = vadd.f32 %v808_v57, %v807_v55  ;;  %v1189_v62 = vpop.f32.mrb[4].mxu0  ;;  %v1205_v63 = vpop.f32.mrb[4].mxu1 }
 0x117   : > { %v680_v2 = vpop.f32.mrb[5].mxu0  ;;  %v744_v3 = vpop.f32.mrb[5].mxu1  ;;  %v689_v16 = vadd.f32 %v1189_v62, %v1579_v37  ;;  %v753_v17 = vadd.f32 %v1205_v63, %v1579_v37 }
 0x118   : > { %v825_v4 = vadd.f32 %v824_v60, %v793_v58  ;;  %v846_v5 = vadd.f32 %v845_v61, %v809_v59  ;;  %v681_v6 = vadd.f32 %v1579_v37, %v680_v2  ;;  %v745_v7 = vadd.f32 %v1579_v37, %v744_v3  ;;  %v1190_v8 = vpop.f32.mrb[6].mxu0  ;;  %v1206_v9 = vpop.f32.mrb[6].mxu1 }
 0x119   : > { %v683_v10 = vpop.f32.mrb[7].mxu0  ;;  %v747_v11 = vpop.f32.mrb[7].mxu1  ;;  %v692_v22 = vadd.f32 %v1190_v8, %v1579_v37  ;;  %v756_v23 = vadd.f32 %v1206_v9, %v1579_v37  ;;  %v797_v28 = vmax.f32 %v689_v16, 0.0  ;;  %v813_v29 = vmax.f32 %v753_v17, 0.0 }
 0x11a   : > { %v795_v12 = vmax.f32 %v681_v6, 0.0  ;;  %v826_v13 = vadd.f32 %v825_v4, %v794_v0  ;;  %v811_v14 = vmax.f32 %v745_v7, 0.0  ;;  %v847_v15 = vadd.f32 %v846_v5, %v810_v1 }
 0x11b   : > { %v684_v18 = vadd.f32 %v1579_v37, %v683_v10  ;;  %v748_v19 = vadd.f32 %v1579_v37, %v747_v11  ;;  %v798_v39 = vmax.f32 %v692_v22, 0.0  ;;  %v814_v40 = vmax.f32 %v756_v23, 0.0 }
 0x11c   : > { %v827_v20 = vadd.f32 %v826_v13, %v795_v12  ;;  %v848_v21 = vadd.f32 %v847_v15, %v811_v14 }
 0x11d   : > { %v796_v24 = vmax.f32 %v684_v18, 0.0  ;;  %v812_v25 = vmax.f32 %v748_v19, 0.0 }
 0x11e   : > { %v1193_v26 = vpop.f32.mrb[8].mxu0  ;;  %v1209_v27 = vpop.f32.mrb[8].mxu1 }
 0x11f   : > { %v828_v30 = vadd.f32 %v827_v20, %v796_v24  ;;  %v849_v31 = vadd.f32 %v848_v21, %v812_v25  ;;  %v696_v32 = vpop.f32.mrb[9].mxu0  ;;  %v760_v33 = vpop.f32.mrb[9].mxu1  ;;  %v705_v45 = vadd.f32 %v1193_v26, %v1579_v37  ;;  %v769_v46 = vadd.f32 %v1209_v27, %v1579_v37 }
 0x120   : > { %v697_v34 = vadd.f32 %v1579_v37, %v696_v32  ;;  %v761_v35 = vadd.f32 %v1579_v37, %v760_v33  ;;  %v1194_v36 = vpop.f32.mrb[10].mxu0  ;;  %v1210_v38 = vpop.f32.mrb[10].mxu1 }
 0x121   : > { %v829_v41 = vadd.f32 %v828_v30, %v797_v28  ;;  %v850_v42 = vadd.f32 %v849_v31, %v813_v29  ;;  %v699_v43 = vpop.f32.mrb[11].mxu0  ;;  %v763_v44 = vpop.f32.mrb[11].mxu1  ;;  %v708_v53 = vadd.f32 %v1194_v36, %v1579_v37  ;;  %v772_v54 = vadd.f32 %v1210_v38, %v1579_v37 }
 0x122   : > { %v799_v47 = vmax.f32 %v697_v34, 0.0  ;;  %v815_v48 = vmax.f32 %v761_v35, 0.0  ;;  %v700_v51 = vadd.f32 %v1579_v37, %v699_v43  ;;  %v764_v52 = vadd.f32 %v1579_v37, %v763_v44 }
 0x123   : > { %v830_v49 = vadd.f32 %v829_v41, %v798_v39  ;;  %v851_v50 = vadd.f32 %v850_v42, %v814_v40  ;;  %v801_v61 = vmax.f32 %v705_v45, 0.0  ;;  %v817_v62 = vmax.f32 %v769_v46, 0.0 }
 0x124   : > { %v800_v57 = vmax.f32 %v700_v51, 0.0  ;;  %v816_v58 = vmax.f32 %v764_v52, 0.0  ;;  %v802_v7 = vmax.f32 %v708_v53, 0.0  ;;  %v818_v8 = vmax.f32 %v772_v54, 0.0  ;;  %v1319_v52 = vld [vmem:[%s1716_s3] sm:$0xff] (!%p1132_p10)   ;;  %v1320_v54 = vld [vmem:[%s1716_s3 + $0x8] sm:$0xff] (!%p1132_p10)  }
 0x125   : > { %v831_v55 = vadd.f32 %v830_v49, %v799_v47  ;;  %v852_v56 = vadd.f32 %v851_v50, %v815_v48  ;;  %v823_v48 = vld [vmem:[#allocation2] sm:$0x3]  ;;  %v1428_v53 = vmov (!%p1132_p10), 0.0  }
 0x126   : > { %v1197_v59 = vpop.f32.mrb[12].mxu0  ;;  %v1213_v60 = vpop.f32.mrb[12].mxu1  ;;  %1215 = vmatprep.subr.bf16.mxu0 (!%p1132_p10), %v1428_v53  ;;  %1231 = vmatprep.mubr.msk.bf16.mxu0 (!%p1132_p10), %vm1429_vm3, %v1428_v53 }
 0x127   : > { %v832_v63 = vadd.f32 %v831_v55, %v800_v57  ;;  %v853_v0 = vadd.f32 %v852_v56, %v816_v58  ;;  %v712_v1 = vpop.f32.mrb[13].mxu0  ;;  %v776_v2 = vpop.f32.mrb[13].mxu1  ;;  %v721_v13 = vadd.f32 %v1197_v59, %v1579_v37  ;;  %v785_v14 = vadd.f32 %v1213_v60, %v1579_v37  ;;  %1216 = vmatpush3.bf16.msra.mxu0 (!%p1132_p10), %v1319_v52  ;;  %v1321_v55 = vld [vmem:[%s1716_s3 + $0x10] sm:$0xff] (!%p1132_p10)   ;;  %v1322_v58 = vld [vmem:[%s1716_s3 + $0x18] sm:$0xff] (!%p1132_p10)   ;;  %v1323_v59 = vld [vmem:[%s1716_s3 + $0x20] sm:$0xff] (!%p1132_p10)  }
 0x128   : > { %v713_v3 = vadd.f32 %v1579_v37, %v712_v1  ;;  %v777_v4 = vadd.f32 %v1579_v37, %v776_v2  ;;  %v1198_v5 = vpop.f32.mrb[14].mxu0  ;;  %v1214_v6 = vpop.f32.mrb[14].mxu1  ;;  %1217 = vmatprep.subr.bf16.mxu0 (!%p1132_p10), %v1428_v53  ;;  %v1324_v60 = vld [vmem:[%s1716_s3 + $0x28] sm:$0xff] (!%p1132_p10)  }
 0x129   : > { %v833_v9 = vadd.f32 %v832_v63, %v801_v61  ;;  %v854_v10 = vadd.f32 %v853_v0, %v817_v62  ;;  %v715_v11 = vpop.f32.mrb[15].mxu0  ;;  %v779_v12 = vpop.f32.mrb[15].mxu1  ;;  %v724_v21 = vadd.f32 %v1198_v5, %v1579_v37  ;;  %v788_v22 = vadd.f32 %v1214_v6, %v1579_v37  ;;  %v1325_v61 = vld [vmem:[%s1716_s3 + $0x30] sm:$0xff] (!%p1132_p10)   ;;  %v1326_v62 = vld [vmem:[%s1716_s3 + $0x38] sm:$0xff] (!%p1132_p10)   ;;  %v1133_v0 = vld [vmem:[%s1717_s4] ss:$0 sm:$0xff] (!%p1132_p10) }
 0x12a   : > { %v803_v15 = vmax.f32 %v713_v3, 0.0  ;;  %v819_v16 = vmax.f32 %v777_v4, 0.0  ;;  %v716_v19 = vadd.f32 %v1579_v37, %v715_v11  ;;  %v780_v20 = vadd.f32 %v1579_v37, %v779_v12 }
 0x12b   : > { %v834_v17 = vadd.f32 %v833_v9, %v802_v7  ;;  %v855_v18 = vadd.f32 %v854_v10, %v818_v8  ;;  %v805_v27 = vmax.f32 %v721_v13, 0.0  ;;  %v821_v28 = vmax.f32 %v785_v14, 0.0  ;;  %1218 = vmatpush3.bf16.msra.mxu0 (!%p1132_p10), %v1320_v54 }
 0x12c   : > { %v804_v25 = vmax.f32 %v716_v19, 0.0  ;;  %v820_v26 = vmax.f32 %v780_v20, 0.0  ;;  %v806_v31 = vmax.f32 %v724_v21, 0.0  ;;  %v822_v32 = vmax.f32 %v788_v22, 0.0  ;;  %1219 = vmatprep.subr.bf16.mxu0 (!%p1132_p10), %v1428_v53 }
 0x12d   : > { %v835_v23 = vadd.f32 %v834_v17, %v803_v15  ;;  %v856_v24 = vadd.f32 %v855_v18, %v819_v16 }
 0x12f   : > { %v836_v29 = vadd.f32 %v835_v23, %v804_v25  ;;  %v857_v30 = vadd.f32 %v856_v24, %v820_v26  ;;  %1220 = vmatpush3.bf16.msra.mxu0 (!%p1132_p10), %v1321_v55 }
 0x130   : > { %1221 = vmatprep.subr.bf16.mxu0 (!%p1132_p10), %v1428_v53 }
 0x131   : > { %v837_v33 = vadd.f32 %v836_v29, %v805_v27  ;;  %v858_v34 = vadd.f32 %v857_v30, %v821_v28 }
 0x133   : > { %v838_v35 = vadd.f32 %v837_v33, %v806_v31  ;;  %v859_v36 = vadd.f32 %v858_v34, %v822_v32  ;;  %1222 = vmatpush3.bf16.msra.mxu0 (!%p1132_p10), %v1322_v58 }
 0x134   : > { %1223 = vmatprep.subr.bf16.mxu0 (!%p1132_p10), %v1428_v53 }
 0x135   : > { %v839_v38 = vrot.slane %v838_v35, 4  ;;  %v860_v39 = vrot.slane %v859_v36, 4 }
 0x137   : > { %v840_v40 = vadd.f32 %v839_v38, %v838_v35  ;;  %v861_v41 = vadd.f32 %v860_v39, %v859_v36  ;;  %1224 = vmatpush3.bf16.msra.mxu0 (!%p1132_p10), %v1323_v59 }
 0x138   : > { %1225 = vmatprep.subr.bf16.mxu0 (!%p1132_p10), %v1428_v53 }
 0x139   : > { %v841_v42 = vrot.slane %v840_v40, 2  ;;  %v862_v37 = vrot.slane %v861_v41, 2 }
 0x13b   : > { %v842_v43 = vadd.f32 %v841_v42, %v840_v40  ;;  %v863_v44 = vadd.f32 %v862_v37, %v861_v41  ;;  %1226 = vmatpush3.bf16.msra.mxu0 (!%p1132_p10), %v1324_v60 }
 0x13c   : > { %1227 = vmatprep.subr.bf16.mxu0 (!%p1132_p10), %v1428_v53 }
 0x13d   : > { %v843_v45 = vrot.slane %v842_v43, 1  ;;  %v864_v46 = vrot.slane %v863_v44, 1 }
 0x13e   : > { %876 = sbr.rel (%p1132_p10) target bundleno = 551 (0x227), region = 89 }
 0x13f   : > { %v844_v47 = vadd.f32 %v843_v45, %v842_v43  ;;  %v865_v49 = vadd.f32 %v864_v46, %v863_v44  ;;  %1228 = vmatpush3.bf16.msra.mxu0 (!%p1132_p10), %v1325_v61 }
 0x140   : > { %1229 = vmatprep.subr.bf16.mxu0 (!%p1132_p10), %v1428_v53 }
 0x141   : > { %v869_v50 = vsel %vm868_vm2, %v865_v49, %v844_v47 }
 0x142   : > { %v871_v51 = vadd.f32 %v869_v50, %v823_v48 }
 0x143   : > { %1230 = vmatpush3.bf16.msra.mxu0 (!%p1132_p10), %v1326_v62 }
 0x144   : > { %872 = vst [vmem:[#allocation2] sm:$0x3] %v871_v51 }
 0x14b   : > { %v877_v56 = vld [vmem:[#allocation2] sm:$0x3] }
 0x14c   : > { %v878_v57 = vmul.f32 0.00390625, %v877_v56 }
 0x14e   : > { %879 = vst [vmem:[#allocation4] sm:$0x3] %v878_v57  ;;  %v880_v63 = vpack.c.bf16 %v878_v57, %v878_v57 }
 0x150   : > { %1232 = vmatmul.mubr.bf16.vlgmr.msra.gmra.mrb[0].mxu0 %v880_v63 }
 0x223   : > { %v986_v1 = vpop.f32.mrb[0].mxu0 }
 0x224   : > { %v987_v2 = vadd.f32 %v1133_v0, %v986_v1  ;;  %v1233_v3 = vpop.f32.mrb[1].mxu0 }
 0x225   : > { %v989_v4 = vpop.f32.mrb[2].mxu0 }
 0x226   : > { %992 = vst [vmem:[#allocation6] sm:$0x3] %v987_v2  ;;  %v1234_v5 = vpop.f32.mrb[3].mxu0 }
 0x227 PF: > { %p1643_p11 = scmp.eq.s32.totalorder %s1087_s26, 1  ;;  %s1430_s9 = smov [#allocation4]  }
 0x228   : > { %s1002_s10 = sshll.u32 %s1430_s9, 4  ;;  %s1431_s11 = smov [#allocation6]   ;;  %s1003_s10 = int_to_ptr.vmem [resolvable:$true] %s1002_s10 }
 0x229   : > { %s1015_s12 = sshll.u32 %s1431_s11, 4  ;;  %s1327_s13 = scalar_lea.vmem %s1003_s10, 32  ;;  %s1647_s12 = int_to_ptr.vmem [resolvable:$true] %s1015_s12 }
 0x22a   : > { %p1328_p12 = scmp.ne.s32.totalorder %s1003_s10, %s1327_s13  ;;  %p1334_p1 = scmp.lt.s32.totalorder %s1003_s10, %s1003_s10 }
 0x22b   : > { %p1335_p2 = scmp.lt.s32.totalorder %s1327_s13, %s1327_s13 }
 0x22c   : > { %p1329_p13 = pnand %p1328_p12, %p1643_p11 }
 0x22d   : > { %p1336_p3 = por %p1335_p2, %p1334_p1 }
 0x22e   : > { %p1330_p0 = pneg %p1329_p13 }
 0x230   : > { %p1337_p4 = pnand %p1336_p3, %p1330_p0 }
 0x232   : > { %1340 = shalt.err (!%p1337_p4)
}
 0x233   : > { %s1341_s14 = scalar_lea.hbm %s1718_s5, 32 }
 0x234   : > { %p1342_p5 = scmp.ne.s32.totalorder %s1718_s5, %s1341_s14  ;;  %p1347_p8 = scmp.lt.u32.totalorder %s1341_s14, %s1718_s5 }
 0x236   : > { %p1343_p6 = pnand %p1342_p5, %p1643_p11 }
 0x238   : > { %p1344_p7 = pneg %p1343_p6 }
 0x23a   : > { %p1349_p9 = pnand %p1347_p8, %p1344_p7 }
 0x23c   : > { %1352 = shalt.err (!%p1349_p9)
}
 0x23d   : > { %1244 = dma.vmem_to_hbm [thread:$0]  (%p1643_p11), %s1003_s10, 32, %s1718_s5, [#allocation5]  }
 0x23e   : > { %s1353_s21 = scalar_lea.vmem %s1647_s12, 32  ;;  %p1360_p0 = scmp.lt.s32.totalorder %s1647_s12, %s1647_s12 }
 0x23f   : > { %p1354_p10 = scmp.ne.s32.totalorder %s1647_s12, %s1353_s21  ;;  %p1361_p1 = scmp.lt.s32.totalorder %s1353_s21, %s1353_s21 }
 0x241   : > { %p1355_p12 = pnand %p1354_p10, %p1643_p11  ;;  %p1362_p2 = por %p1361_p1, %p1360_p0 }
 0x243   : > { %p1356_p13 = pneg %p1355_p12 }
 0x245   : > { %p1363_p3 = pnand %p1362_p2, %p1356_p13 }
 0x247   : > { %1366 = shalt.err (!%p1363_p3)
}
 0x248   : > { %s1367_s7 = scalar_lea.hbm %s1719_s6, 32 }
 0x249   : > { %p1368_p4 = scmp.ne.s32.totalorder %s1719_s6, %s1367_s7  ;;  %p1373_p7 = scmp.lt.u32.totalorder %s1367_s7, %s1719_s6 }
 0x24b   : > { %p1369_p5 = pnand %p1368_p4, %p1643_p11 }
 0x24d   : > { %p1370_p6 = pneg %p1369_p5 }
 0x24f   : > { %p1375_p8 = pnand %p1373_p7, %p1370_p6 }
 0x251   : > { %1378 = shalt.err (!%p1375_p8)
}
 0x252   : > { %1246 = dma.vmem_to_hbm [thread:$0]  (%p1643_p11), %s1647_s12, 32, %s1719_s6, [#allocation7]  }
 0x253   : > { %1400 = dma.done.wait (%p1643_p11), [#allocation5], 32  }
 0x254   : > { %1402 = vsyncadd (%p1643_p11), [#allocation5], 4294967264 }
 0x255   : > { %1404 = dma.done.wait (%p1643_p11), [#allocation7], 32  }
 0x256   : > { %1406 = vsyncadd (%p1643_p11), [#allocation7], 4294967264 }
 0x257 PF: > { %s19_s25 = sadd.s32 1, %s1425_s25   ;;  %s1721_s21 = smov %s1413_s22 }
 0x258   : > { %p16_p9 = scmp.ge.s32.totalorder %s19_s25, 4   ;;  %s1722_s22 = smov %s1503_s30 }
 0x259   : > { %s1723_s23 = smov %s1421_s24  ;;  %s1724_s24 = smov %s1726_s27 }
 0x25a   :  { %18 = sbr.rel (!%p16_p9) target bundleno = 4 (0x4), region = 131 }
 0x261   :  { %1032 = vsyncpa [#allocation5], 1 }
 0x262   :  { %1034 = vsyncpa [#allocation5 + $0x1], 1 }
 0x263   :  { %1035 = vsyncpa [#allocation7], 1 }

</bundles_post_ra>
